<compile_context>
chip_gen: v7x
topology: tpu7x:2x2x1
jax: 0.10.0
libtpu: 0.0.40
codegen_flags: <defaults>
</compile_context>

<pallas_src>
import functools

import jax
import jax.numpy as jnp
from jax import lax
from jax.experimental import pallas as pl
from jax.experimental.pallas import tpu as pltpu


def _round_up(a, b):
    return ((a + b - 1) // b) * b


def _dice_sums_kernel(x_ref, t_ref, inter_ref, denom_ref, *,
                      tile_c, m_total, k_per_chunk, c_tiles, need_mask):
    p = pl.program_id(1)          # parallel column-chunk index
    k = pl.program_id(2)          # reduction step within the chunk

    @pl.when(k == 0)
    def _():
        inter_ref[...] = jnp.zeros_like(inter_ref)
        denom_ref[...] = jnp.zeros_like(denom_ref)

    # Native-dtype stream; cast to f32 after the load (v5e VPU has no bf16).
    x = x_ref[...].astype(jnp.float32)          # (tile_n, tile_c)
    t = t_ref[...].astype(jnp.float32)

    def accumulate(xv, tv):
        # Fused denominator: sum(x) + sum(t) == sum(x + t).  Accumulate
        # directly into the VMEM-resident output blocks (no scratch).
        inter_ref[...] += jnp.sum(xv * tv, axis=1, keepdims=True)
        denom_ref[...] += jnp.sum(xv + tv, axis=1, keepdims=True)

    if need_mask:
        gk = p * k_per_chunk + k                # global column-tile index

        @pl.when(gk < c_tiles - 1)
        def _():                                # interior tile: no mask cost
            accumulate(x, t)

        @pl.when(gk >= c_tiles - 1)
        def _():                                # ragged / out-of-range tile
            col = lax.broadcasted_iota(jnp.int32, x.shape, 1)
            valid = col < (m_total - gk * tile_c)
            accumulate(jnp.where(valid, x, 0.0), jnp.where(valid, t, 0.0))
    else:
        accumulate(x, t)


def binary_dice_loss(inputs, targets, weight=None, smooth=1,
                     block_budget_bytes=2 * 1024 * 1024):
    """JAX/Pallas equivalent of BinaryDiceLoss.forward (returns a scalar)."""
    # NOTE: matches the provided spec: denominator = sum(x) + sum(t) (p = 1).
    smooth = float(smooth) if smooth is not None else 1.0
    n = targets.shape[0]
    lanes = 128

    x2 = inputs.reshape(n, -1)        # native dtype, contiguous reshape, no pad
    t2 = targets.reshape(n, -1)
    m = x2.shape[1]

    itemsize = max(jnp.dtype(x2.dtype).itemsize, jnp.dtype(t2.dtype).itemsize)
    packing = max(1, 4 // max(1, itemsize))
    sub = 8 * packing                 # sublane granularity for this dtype
    c_full = _round_up(m, lanes)      # lane-rounded row length (never padded)

    # ---- tile selection (account for sublane padding in VMEM) -------------
    padded_group_bytes = sub * c_full * itemsize   # one sublane group, full row
    if padded_group_bytes <= block_budget_bytes:
        # Whole rows fit: single column tile; batch samples per grid step so
        # the fixed per-step overhead is amortized for small C*H*W.
        tile_c = c_full
        groups_fit = block_budget_bytes // padded_group_bytes
        tile_n = min(n, groups_fit * sub)
    else:
        # Large samples: column-tile one sublane group of samples per block.
        tile_n = min(n, sub)
        tile_c = max(lanes,
                     (block_budget_bytes // (sub * itemsize)) // lanes * lanes)
        tile_c = min(tile_c, c_full)

    n_tiles = pl.cdiv(n, tile_n)
    c_tiles = pl.cdiv(m, tile_c)

    # v7x: split the reduction into P parallel column chunks when the sample
    # axis alone cannot keep both TensorCores busy.  Harmless on v5e/v6e.
    p_split = 2 if (c_tiles >= 2 and n_tiles % 2 == 1) else 1
    k_per_chunk = pl.cdiv(c_tiles, p_split)
    oob_steps = p_split * k_per_chunk != c_tiles     # last chunk over-covers
    need_mask = (m % tile_c != 0) or oob_steps

    if oob_steps:
        def col_block(pidx, kidx):
            # Clamp so the DMA stays in bounds; the kernel zero-masks the
            # duplicated tile, so it contributes nothing.
            return jnp.minimum(pidx * k_per_chunk + kidx, c_tiles - 1)
    else:
        def col_block(pidx, kidx):
            return pidx * k_per_chunk + kidx

    kernel = functools.partial(
        _dice_sums_kernel, tile_c=tile_c, m_total=m,
        k_per_chunk=k_per_chunk, c_tiles=c_tiles, need_mask=need_mask)

    in_spec = pl.BlockSpec((tile_n, tile_c),
                           lambda s, p, k: (s, col_block(p, k)))
    out_spec = pl.BlockSpec((None, tile_n, 1), lambda s, p, k: (p, s, 0))

    inter_p, denom_p = pl.pallas_call(
        kernel,
        out_shape=(jax.ShapeDtypeStruct((p_split, n, 1), jnp.float32),
                   jax.ShapeDtypeStruct((p_split, n, 1), jnp.float32)),
        grid_spec=pltpu.PrefetchScalarGridSpec(
            num_scalar_prefetch=0,
            grid=(n_tiles, p_split, k_per_chunk),
            in_specs=[in_spec, in_spec],
            out_specs=(out_spec, out_spec),
        ),
        compiler_params=pltpu.CompilerParams(
            dimension_semantics=("parallel", "parallel", "arbitrary"),
            vmem_limit_bytes=32 * 1024 * 1024),
    )(x2, t2)

    # Tiny O(N * P) epilogue in the wrapper (combine partials + dice + mean).
    inter = jnp.sum(inter_p, axis=(0, 2))
    denom = jnp.sum(denom_p, axis=(0, 2))
    dice = (2.0 * inter + smooth) / (denom + smooth + 1e-6)
    if weight is not None:
        loss = (1.0 - dice) * jnp.asarray(weight, jnp.float32).reshape(-1)
    else:
        loss = 1.0 - dice
    return jnp.mean(loss)


def _reference(inputs, targets, weight=None, smooth=1):
    smooth = smooth if smooth is not None else 1
    n = targets.shape[0]
    xf = inputs.reshape(n, -1).astype(jnp.float32)
    tf = targets.reshape(n, -1).astype(jnp.float32)
    inter = (xf * tf).sum(1)
    dice = (2 * inter + smooth) / (xf.sum(1) + tf.sum(1) + smooth + 1e-6)
    loss = (1 - dice) * weight if weight is not None else 1 - dice
    return loss.mean()


if __name__ == "__main__":
    key = jax.random.PRNGKey(0)
    k1, k2, k3, k4, k5, k6, k7 = jax.random.split(key, 7)

    # 1) Small-sample regime: whole batch handled in one grid step.
    N, C, H, W = 2, 4, 16, 16
    x1 = jax.nn.sigmoid(jax.random.normal(k1, (N, C, H, W), jnp.float32))
    t1 = (jax.random.uniform(k2, (N, C, H, W)) > 0.5).astype(jnp.float32)
    w1 = jax.random.uniform(k3, (N,), jnp.float32)

    out = binary_dice_loss(x1, t1)
    jax.block_until_ready(out)
    ref = _reference(x1, t1)
    assert jnp.allclose(out, ref, atol=1e-5, rtol=1e-5), (out, ref)

    out_w = binary_dice_loss(x1, t1, weight=w1)
    jax.block_until_ready(out_w)
    ref_w = _reference(x1, t1, weight=w1)
    assert jnp.allclose(out_w, ref_w, atol=1e-5, rtol=1e-5), (out_w, ref_w)

    # 2) Ragged flattened length (C*H*W % 128 != 0): in-kernel lane-tail mask,
    #    no wrapper-side padding.
    x2 = jax.nn.sigmoid(jax.random.normal(k4, (2, 3, 5, 7), jnp.float32))
    t2 = (jax.random.uniform(k5, (2, 3, 5, 7)) > 0.5).astype(jnp.float32)
    out2 = binary_dice_loss(x2, t2)
    jax.block_until_ready(out2)
    ref2 = _reference(x2, t2)
    assert jnp.allclose(out2, ref2, atol=1e-5, rtol=1e-5), (out2, ref2)

    # 3) Single large sample: column-tiled reduction split into P=2 parallel
    #    chunks (exercises the v7x partial-sum path + clamped index map).
    x3 = jax.nn.sigmoid(jax.random.normal(k6, (1, 3, 256, 256), jnp.float32))
    t3 = (jax.random.uniform(k7, (1, 3, 256, 256)) > 0.5).astype(jnp.float32)
    out3 = binary_dice_loss(x3, t3)
    jax.block_until_ready(out3)
    ref3 = _reference(x3, t3)
    assert jnp.allclose(out3, ref3, atol=1e-4, rtol=1e-4), (out3, ref3)

    print("KERNEL_OK")
</pallas_src>

<mosaic_0001>
module attributes {stable_mosaic.version = 11 : i64} {
  func.func @_dice_sums_kernel(%arg0: i32, %arg1: i32, %arg2: i32, %arg3: memref<2x1024xf32, #tpu.memory_space<vmem>>, %arg4: memref<2x1024xf32, #tpu.memory_space<vmem>>, %arg5: memref<1x2x1xf32, #tpu.memory_space<vmem>>, %arg6: memref<1x2x1xf32, #tpu.memory_space<vmem>>) attributes {dimension_semantics = [#tpu.dimension_semantics<parallel>, #tpu.dimension_semantics<parallel>, #tpu.dimension_semantics<arbitrary>], iteration_bounds = array<i64: 1, 1, 1>, scalar_prefetch = 0 : i64, scratch_operands = 0 : i64, tpu.core_type = #tpu.core_type<tc>, window_params = [{transform_indices = @transform_0, window_bounds = array<i64: 2, 1024>}, {transform_indices = @transform_1, window_bounds = array<i64: 2, 1024>}, {transform_indices = @transform_2, window_bounds = array<i64: 1, 2, 1>}, {transform_indices = @transform_3, window_bounds = array<i64: 1, 2, 1>}]} {
    %c0_i32 = arith.constant 0 : i32
    %0 = arith.cmpi eq, %arg2, %c0_i32 : i32
    %1 = arith.extui %0 : i1 to i32
    %c0_i32_0 = arith.constant 0 : i32
    %2 = arith.cmpi ne, %1, %c0_i32_0 : i32
    scf.if %2 {
      %cst_17 = arith.constant 0.000000e+00 : f32
      %23 = vector.broadcast %cst_17 : f32 to vector<2x1xf32>
      %c0_18 = arith.constant 0 : index
      %c0_19 = arith.constant 0 : index
      %c0_20 = arith.constant 0 : index
      %24 = vector.load %arg5[%c0_18, %c0_19, %c0_20] : memref<1x2x1xf32, #tpu.memory_space<vmem>>, vector<1x2x1xf32>
      %25 = vector.shape_cast %24 : vector<1x2x1xf32> to vector<2x1xf32>
      %26 = vector.shape_cast %23 : vector<2x1xf32> to vector<1x2x1xf32>
      tpu.vector_store %arg5[%c0_18, %c0_19, %c0_20], %26 {strides = array<i32>} : memref<1x2x1xf32, #tpu.memory_space<vmem>>, vector<1x2x1xf32>,
      %cst_21 = arith.constant 0.000000e+00 : f32
      %27 = vector.broadcast %cst_21 : f32 to vector<2x1xf32>
      %c0_22 = arith.constant 0 : index
      %c0_23 = arith.constant 0 : index
      %c0_24 = arith.constant 0 : index
      %28 = vector.load %arg6[%c0_22, %c0_23, %c0_24] : memref<1x2x1xf32, #tpu.memory_space<vmem>>, vector<1x2x1xf32>
      %29 = vector.shape_cast %28 : vector<1x2x1xf32> to vector<2x1xf32>
      %30 = vector.shape_cast %27 : vector<2x1xf32> to vector<1x2x1xf32>
      tpu.vector_store %arg6[%c0_22, %c0_23, %c0_24], %30 {strides = array<i32>} : memref<1x2x1xf32, #tpu.memory_space<vmem>>, vector<1x2x1xf32>,
    } else {
    }
    %c0 = arith.constant 0 : index
    %c0_1 = arith.constant 0 : index
    %3 = vector.load %arg3[%c0, %c0_1] : memref<2x1024xf32, #tpu.memory_space<vmem>>, vector<2x1024xf32>
    %c0_2 = arith.constant 0 : index
    %c0_3 = arith.constant 0 : index
    %4 = vector.load %arg4[%c0_2, %c0_3] : memref<2x1024xf32, #tpu.memory_space<vmem>>, vector<2x1024xf32>
    %c0_4 = arith.constant 0 : index
    %c0_5 = arith.constant 0 : index
    %c0_6 = arith.constant 0 : index
    %5 = vector.load %arg5[%c0_4, %c0_5, %c0_6] : memref<1x2x1xf32, #tpu.memory_space<vmem>>, vector<1x2x1xf32>
    %6 = vector.shape_cast %5 : vector<1x2x1xf32> to vector<2x1xf32>
    %7 = arith.mulf %3, %4 : vector<2x1024xf32>
    %cst = arith.constant dense<0.000000e+00> : vector<2xf32>
    %8 = vector.multi_reduction <add>, %7, %cst [1] : vector<2x1024xf32> to vector<2xf32>
    %9 = vector.shape_cast %8 : vector<2xf32> to vector<2x1xf32>
    %10 = arith.addf %6, %9 : vector<2x1xf32>
    %c0_7 = arith.constant 0 : index
    %c0_8 = arith.constant 0 : index
    %c0_9 = arith.constant 0 : index
    %11 = vector.load %arg5[%c0_7, %c0_8, %c0_9] : memref<1x2x1xf32, #tpu.memory_space<vmem>>, vector<1x2x1xf32>
    %12 = vector.shape_cast %11 : vector<1x2x1xf32> to vector<2x1xf32>
    %13 = vector.shape_cast %10 : vector<2x1xf32> to vector<1x2x1xf32>
    tpu.vector_store %arg5[%c0_7, %c0_8, %c0_9], %13 {strides = array<i32>} : memref<1x2x1xf32, #tpu.memory_space<vmem>>, vector<1x2x1xf32>,
    %c0_10 = arith.constant 0 : index
    %c0_11 = arith.constant 0 : index
    %c0_12 = arith.constant 0 : index
    %14 = vector.load %arg6[%c0_10, %c0_11, %c0_12] : memref<1x2x1xf32, #tpu.memory_space<vmem>>, vector<1x2x1xf32>
    %15 = vector.shape_cast %14 : vector<1x2x1xf32> to vector<2x1xf32>
    %16 = arith.addf %3, %4 : vector<2x1024xf32>
    %cst_13 = arith.constant dense<0.000000e+00> : vector<2xf32>
    %17 = vector.multi_reduction <add>, %16, %cst_13 [1] : vector<2x1024xf32> to vector<2xf32>
    %18 = vector.shape_cast %17 : vector<2xf32> to vector<2x1xf32>
    %19 = arith.addf %15, %18 : vector<2x1xf32>
    %c0_14 = arith.constant 0 : index
    %c0_15 = arith.constant 0 : index
    %c0_16 = arith.constant 0 : index
    %20 = vector.load %arg6[%c0_14, %c0_15, %c0_16] : memref<1x2x1xf32, #tpu.memory_space<vmem>>, vector<1x2x1xf32>
    %21 = vector.shape_cast %20 : vector<1x2x1xf32> to vector<2x1xf32>
    %22 = vector.shape_cast %19 : vector<2x1xf32> to vector<1x2x1xf32>
    tpu.vector_store %arg6[%c0_14, %c0_15, %c0_16], %22 {strides = array<i32>} : memref<1x2x1xf32, #tpu.memory_space<vmem>>, vector<1x2x1xf32>,
    return
  }
  func.func @transform_0(%arg0: i32, %arg1: i32, %arg2: i32) -> (i32, i32) {
    %c1_i32 = arith.constant 1 : i32
    %0 = arith.muli %arg1, %c1_i32 : i32
    %1 = arith.addi %0, %arg2 : i32
    %c0_i32 = arith.constant 0 : i32
    return %arg0, %1 : i32, i32
  }
  func.func @transform_1(%arg0: i32, %arg1: i32, %arg2: i32) -> (i32, i32) {
    %c1_i32 = arith.constant 1 : i32
    %0 = arith.muli %arg1, %c1_i32 : i32
    %1 = arith.addi %0, %arg2 : i32
    %c0_i32 = arith.constant 0 : i32
    return %arg0, %1 : i32, i32
  }
  func.func @transform_2(%arg0: i32, %arg1: i32, %arg2: i32) -> (i32, i32, i32) {
    %c0_i32 = arith.constant 0 : i32
    %c0_i32_0 = arith.constant 0 : i32
    return %arg1, %arg0, %c0_i32 : i32, i32, i32
  }
  func.func @transform_3(%arg0: i32, %arg1: i32, %arg2: i32) -> (i32, i32, i32) {
    %c0_i32 = arith.constant 0 : i32
    %c0_i32_0 = arith.constant 0 : i32
    return %arg1, %arg0, %c0_i32 : i32, i32, i32
  }
}

</mosaic_0001>

<bundles_post_ra>
// kernel: tpu_custom_call.1
= control target key start
LH: loop header
LB: loop body
LE: loop exit
PB: predicated region body
PF: predicated region fallthrough
CT: control target
= control target key end

     0   :  { %9 = vsyncpa [#allocation3], 0  ;;  %s342_s0 = inlined_call_operand.hbm [shape: f32[2,1024], index: 0, kind: input, shape index: {}]   ;;  %s343_s1 = inlined_call_operand.hbm [shape: f32[2,1024], index: 1, kind: input, shape index: {}]   ;;  %s344_s2 = inlined_call_operand.vmem [shape: f32[1,2,1], index: 2, kind: output, shape index: {0}]   ;;  %s345_s3 = inlined_call_operand.vmem [shape: f32[1,2,1], index: 3, kind: output, shape index: {1}]  }
   0x1   :  { %10 = vsyncpa [#allocation5], 0  ;;  %s256_s12 = smov [#allocation2]   ;;  %s257_s14 = smov [#allocation4]  }
   0x2   :  { %s21_s13 = sshll.u32 %s256_s12, 4  ;;  %s35_s15 = sshll.u32 %s257_s14, 4  ;;  %s22_s13 = int_to_ptr.vmem [resolvable:$true] %s21_s13  ;;  %s36_s15 = int_to_ptr.vmem [resolvable:$true] %s35_s15 }
   0x3   :  { %s208_s18 = scalar_lea.hbm %s342_s0, 256 }
   0x4   :  { %p209_p0 = scmp.ne.s32.totalorder %s342_s0, %s208_s18  ;;  %p212_p1 = scmp.lt.u32.totalorder %s208_s18, %s342_s0 }
   0x6   :  { %p214_p2 = pnand %p212_p1, %p209_p0 }
   0x8   :  { %217 = shalt.err (!%p214_p2)
}
   0x9   :  { %s218_s23 = scalar_lea.vmem %s22_s13, 256  ;;  %p223_p4 = scmp.lt.s32.totalorder %s22_s13, %s22_s13 }
   0xa   :  { %p219_p3 = scmp.ne.s32.totalorder %s22_s13, %s218_s23  ;;  %p224_p5 = scmp.lt.s32.totalorder %s218_s23, %s218_s23 }
   0xc   :  { %p225_p6 = por %p224_p5, %p223_p4 }
   0xe   :  { %p226_p7 = pnand %p225_p6, %p219_p3 }
  0x10   :  { %229 = shalt.err (!%p226_p7)
}
  0x11   :  { %24 = dma.hbm_to_vmem [thread:$0]  %s342_s0, 256, %s22_s13, [#allocation3]  }
  0x12   :  { %s230_s28 = scalar_lea.hbm %s343_s1, 256 }
  0x13   :  { %p231_p8 = scmp.ne.s32.totalorder %s343_s1, %s230_s28  ;;  %p234_p9 = scmp.lt.u32.totalorder %s230_s28, %s343_s1 }
  0x15   :  { %p236_p10 = pnand %p234_p9, %p231_p8 }
  0x17   :  { %239 = shalt.err (!%p236_p10)
}
  0x18   :  { %s240_s6 = scalar_lea.vmem %s36_s15, 256  ;;  %p245_p12 = scmp.lt.s32.totalorder %s36_s15, %s36_s15 }
  0x19   :  { %p241_p11 = scmp.ne.s32.totalorder %s36_s15, %s240_s6  ;;  %p246_p13 = scmp.lt.s32.totalorder %s240_s6, %s240_s6 }
  0x1b   :  { %p247_p0 = por %p246_p13, %p245_p12 }
  0x1d   :  { %p248_p1 = pnand %p247_p0, %p241_p11 }
  0x1f   :  { %251 = shalt.err (!%p248_p1)
}
  0x20   :  { %38 = dma.hbm_to_vmem [thread:$0]  %s343_s1, 256, %s36_s15, [#allocation5]  }
  0x21   :  { %252 = dma.done.wait [#allocation3], 256  }
  0x22   :  { %253 = vsyncadd [#allocation3], 4294967040 }
  0x23   :  { %254 = dma.done.wait [#allocation5], 256  }
  0x24   :  { %255 = vsyncadd [#allocation5], 4294967040  ;;  %v69_v0 = vlaneseq  ;;  %vm53_vm0 = vcmask 1024   ;;  %v258_v1 = vmov 1983009808   ;;  %v259_v4 = vmov 0.0  }
  0x25   :  { %v67_v2 = vunpack.c.l.s4 %v258_v1  ;;  %54 = vst.msk [vmem:[%s344_s2] sm:$0x3] %vm53_vm0, %v259_v4  ;;  %55 = vst.msk [vmem:[%s345_s3] sm:$0x3] %vm53_vm0, %v259_v4  ;;  %v56_v7 = vld [vmem:[#allocation2] sm:$0xff]  ;;  %v57_v8 = vld [vmem:[#allocation2 + $0x8] sm:$0xff] }
  0x26   :  { %v70_v3 = vshrl.u32 %v69_v0, 7  ;;  %v58_v9 = vld [vmem:[#allocation4] sm:$0xff]  ;;  %v59_v10 = vld [vmem:[#allocation4 + $0x8] sm:$0xff]  ;;  %vm107_vm1 = vcmask 1041408  }
  0x27   :  { %v68_v5 = vunpack.c.0.s8 %v67_v2  ;;  %v61_v11 = vmul.f32 %v58_v9, %v56_v7  ;;  %v129_v12 = vadd.f32 %v58_v9, %v56_v7  ;;  %v62_v13 = vmul.f32 %v59_v10, %v57_v8 }
  0x28   :  { %v130_v20 = vadd.f32 %v59_v10, %v57_v8 }
  0x29   :  { %v71_v6 = vsub.s32 %v68_v5, %v70_v3  ;;  %v65_v14 = vcombine.high %v61_v11, %v61_v11  ;;  %v133_v16 = vcombine.high %v129_v12, %v129_v12  ;;  %v82_v18 = vcombine.high %v62_v13, %v62_v13 }
  0x2a   :  { %v150_v31 = vcombine.high %v130_v20, %v130_v20 }
  0x2b   :  { %v72_v15 = vrot.slane %v61_v11, %v71_v6  ;;  %v140_v17 = vrot.slane %v129_v12, %v71_v6  ;;  %v89_v19 = vrot.slane %v62_v13, %v71_v6  ;;  %v79_v21 = vrot.slane %v65_v14, %v71_v6 }
  0x2c   :  { %v147_v24 = vrot.slane %v133_v16, %v71_v6  ;;  %v157_v32 = vrot.slane %v130_v20, %v71_v6  ;;  %v96_v33 = vrot.slane %v82_v18, %v71_v6  ;;  %v164_v43 = vrot.slane %v150_v31, %v71_v6  ;;  %v60_v1 = vld [vmem:[%s344_s2] sm:$0x3] }
  0x2d   :  { %v80_v22 = vcombine.high %v72_v15, %v72_v15  ;;  %v108_v23 = vsel %vm107_vm1, %v72_v15, 0.0  ;;  %v148_v25 = vcombine.high %v140_v17, %v140_v17  ;;  %v81_v26 = vcombine.high %v79_v21, %v79_v21  ;;  %v128_v4 = vld [vmem:[%s345_s3] sm:$0x3] }
  0x2e   :  { %v111_v28 = vsel %vm107_vm1, %v79_v21, 0.0  ;;  %v149_v30 = vcombine.high %v147_v24, %v147_v24  ;;  %v97_v34 = vcombine.high %v89_v19, %v89_v19  ;;  %v175_v36 = vsel %vm107_vm1, %v140_v17, 0.0 }
  0x2f   :  { %v109_v27 = vsel %vm107_vm1, %v80_v22, 0.0  ;;  %v113_v35 = vsel %vm107_vm1, %v81_v26, 0.0  ;;  %v176_v38 = vsel %vm107_vm1, %v148_v25, 0.0  ;;  %v178_v39 = vsel %vm107_vm1, %v147_v24, 0.0 }
  0x30   :  { %v110_v29 = vadd.f32 %v109_v27, %v108_v23  ;;  %v115_v40 = vsel %vm107_vm1, %v89_v19, 0.0  ;;  %v177_v41 = vadd.f32 %v176_v38, %v175_v36  ;;  %v165_v44 = vcombine.high %v157_v32, %v157_v32 }
  0x31   :  { %v180_v45 = vsel %vm107_vm1, %v149_v30, 0.0  ;;  %v98_v46 = vcombine.high %v96_v33, %v96_v33  ;;  %v117_v47 = vsel %vm107_vm1, %v97_v34, 0.0  ;;  %v182_v50 = vsel %vm107_vm1, %v157_v32, 0.0 }
  0x32   :  { %v112_v37 = vadd.f32 %v111_v28, %v110_v29  ;;  %v179_v48 = vadd.f32 %v178_v39, %v177_v41  ;;  %v119_v51 = vsel %vm107_vm1, %v96_v33, 0.0  ;;  %v166_v54 = vcombine.high %v164_v43, %v164_v43 }
  0x33   :  { %v184_v55 = vsel %vm107_vm1, %v165_v44, 0.0  ;;  %v121_v56 = vsel %vm107_vm1, %v98_v46, 0.0  ;;  %v186_v59 = vsel %vm107_vm1, %v164_v43, 0.0 }
  0x34   :  { %v114_v42 = vadd.f32 %v113_v35, %v112_v37  ;;  %v181_v52 = vadd.f32 %v180_v45, %v179_v48  ;;  %v188_v62 = vsel %vm107_vm1, %v166_v54, 0.0 }
  0x36   :  { %v116_v49 = vadd.f32 %v115_v40, %v114_v42  ;;  %v183_v57 = vadd.f32 %v182_v50, %v181_v52 }
  0x38   :  { %v118_v53 = vadd.f32 %v117_v47, %v116_v49  ;;  %v185_v60 = vadd.f32 %v184_v55, %v183_v57 }
  0x3a   :  { %v120_v58 = vadd.f32 %v119_v51, %v118_v53  ;;  %v187_v63 = vadd.f32 %v186_v59, %v185_v60 }
  0x3c   :  { %v122_v61 = vadd.f32 %v121_v56, %v120_v58  ;;  %v189_v0 = vadd.f32 %v188_v62, %v187_v63 }
  0x3e   :  { %123 = vadd.xlane.f32.xlu0 %v122_v61 }
  0x42   :  { %190 = vadd.xlane.f32.xlu0 %v189_v0 }
  0xcb   :  { %v124_v2 = vpop.xlane.xlu0 %123 }
  0xcc   :  { %v125_v3 = vadd.f32 %v124_v2, %v60_v1 }
  0xce   :  { %127 = vst.msk [vmem:[%s344_s2] sm:$0x3] %vm53_vm0, %v125_v3 }
  0xcf   :  { %v191_v5 = vpop.xlane.xlu0 %190 }
  0xd0   :  { %v192_v6 = vadd.f32 %v191_v5, %v128_v4 }
  0xd2   :  { %193 = vst.msk [vmem:[%s345_s3] sm:$0x3] %vm53_vm0, %v192_v6 }
  0xd3   :  { %202 = vsyncpa [#allocation3], 1 }
  0xd4   :  { %203 = vsyncpa [#allocation5], 1 }

</bundles_post_ra>
